<compile_context>
chip_gen: v5e
topology: v5e:2x2
jax: 0.10.0
libtpu: 0.0.40
codegen_flags: <defaults>
</compile_context>

<pallas_src>
import functools

import jax
import jax.numpy as jnp
from jax.experimental import pallas as pl
from jax.experimental.pallas import tpu as pltpu


def _round_up(x, m):
    return (x + m - 1) // m * m


def _pad_to(x, shape):
    pads = [(0, s - d) for d, s in zip(x.shape, shape)]
    return jnp.pad(x, pads)


def _physical_vmem_bytes():
    """Best-effort physical VMEM capacity; conservative fallback."""
    try:
        cap = getattr(pltpu.get_tpu_info(), "vmem_capacity_bytes", None)
        if cap:
            return int(cap)
    except Exception:
        pass
    try:
        kind = jax.devices()[0].device_kind.lower()
    except Exception:
        kind = ""
    if ("v2" in kind) or ("v3" in kind):
        return 16 * 1024 * 1024
    if ("v4" in kind) or ("v5" in kind) or ("v6" in kind):
        return 128 * 1024 * 1024
    return 64 * 1024 * 1024  # v7x / unknown: conservative


def _sage_fused_kernel(a_ref, h0_ref, w_ref, b_ref, o_ref, hw0_ref, hw1_ref, *,
                       tile_m, num_layers):
    # Grid = (step, row_tile), both sequential ("arbitrary").
    #   step 0            : prologue, HW_0 = H0 @ W0 computed tile-by-tile into hw0.
    #   step s (1..L)     : layer s-1 aggregation  out = A_tile @ HW_{s-1} + b_{s-1},
    #                       plus (if s < L) the fold-ahead transform
    #                       HW_s[tile] = relu(out) @ W_s  into the *other* HW buffer.
    # HW double-buffers: even steps write hw0, odd steps write hw1, so every row tile
    # of step s reads a buffer that was fully written during step s-1.
    s = pl.program_id(0)
    i = pl.program_id(1)
    row0 = pl.multiple_of(i * tile_m, tile_m)

    @pl.when(s == 0)
    def _prologue():
        hw0_ref[pl.ds(row0, tile_m), :] = jnp.dot(
            h0_ref[...], w_ref[0], preferred_element_type=jnp.float32
        ).astype(hw0_ref.dtype)

    def _agg_step(src_hw, dst_hw):
        out = (
            jnp.dot(a_ref[...], src_hw[...], preferred_element_type=jnp.float32)
            + b_ref[0]
        )

        # Fold-ahead feature transform for the next layer (skipped on the last layer).
        @pl.when(s < num_layers)
        def _():
            h_next = jnp.maximum(out, 0.0).astype(dst_hw.dtype)
            dst_hw[pl.ds(row0, tile_m), :] = jnp.dot(
                h_next, w_ref[0], preferred_element_type=jnp.float32
            ).astype(dst_hw.dtype)

        # Last layer: no activation, emit the pre-activation as the result.
        @pl.when(s == num_layers)
        def _():
            o_ref[...] = out.astype(o_ref.dtype)

    odd = s % 2

    @pl.when((s > 0) & (odd == 1))
    def _():
        _agg_step(hw0_ref, hw1_ref)

    @pl.when((s > 0) & (odd == 0))
    def _():
        _agg_step(hw1_ref, hw0_ref)


def graphsage_forward(a_hat, h, params):
    """Fused multi-layer GraphConv forward. params: list of (W, b)."""
    N = h.shape[0]
    num_layers = len(params)
    out_dim = params[-1][0].shape[1]

    # Lane-dense padding: every feature width -> one multiple-of-128 width; rows of
    # A_hat / H -> multiple of 128. Zero padding is mathematically exact.
    feat_dims = [h.shape[1]] + [w.shape[1] for w, _ in params]
    fp = _round_up(max(feat_dims), 128)
    n_p = _round_up(max(N, 1), 128)

    # Per-generation VMEM budget (v7x has half the VMEM of v5e/v6e).
    phys_vmem = _physical_vmem_bytes()
    vmem_limit = max(int(phys_vmem * 3 // 4), 8 * 1024 * 1024)
    budget = vmem_limit - (2 << 20)  # headroom for compiler-internal scratch

    def _plan_bytes(tm, n_rows):
        a_in = 2 * tm * n_rows * 2      # bf16 A tile, double-buffered
        h0_in = 2 * tm * fp * 2         # bf16 feature tile
        w_in = 2 * fp * fp * 2          # bf16 weight block
        b_in = 2 * 8 * fp * 4           # f32 bias block (sublane-padded)
        out_b = 2 * tm * fp * 4         # f32 output tile
        hw_sc = 2 * n_rows * fp * 2     # two resident bf16 HW scratch buffers
        return a_in + h0_in + w_in + b_in + out_b + hw_sc

    if _plan_bytes(n_p, n_p) <= budget:
        # A_hat fully resident in VMEM (constant block index -> DMA'd once, reused by
        # every layer). This is the dominant bandwidth win for small/medium graphs.
        tile_m = n_p
    else:
        tile_m = 128
        for cand in (512, 256):
            if _plan_bytes(cand, n_p) <= budget:
                tile_m = cand
                break
        n_p = _round_up(n_p, tile_m)
        # TODO(synk): this path re-streams A_hat once per layer; a manual-DMA resident
        # copy (pl.ANY + make_async_copy) or a K-tiled accumulator grid would remove it.

    # bf16 MXU operands; bias stays f32 (added to the f32 accumulator).
    a_p = _pad_to(a_hat.astype(jnp.float32), (n_p, n_p)).astype(jnp.bfloat16)
    h_p = _pad_to(h.astype(jnp.float32), (n_p, fp)).astype(jnp.bfloat16)

    # w_stack[s] = W_s for s < L, plus one dummy block (unused on the final step) so the
    # W index map is just `s`. b_stack[s] = b_{s-1} for s >= 1, dummy at index 0.
    w_list = [_pad_to(w.astype(jnp.float32), (fp, fp)) for w, _ in params]
    w_list.append(jnp.zeros((fp, fp), jnp.float32))
    w_p = jnp.stack(w_list).astype(jnp.bfloat16)          # (L+1, fp, fp)

    b_list = [jnp.zeros((1, fp), jnp.float32)]
    b_list += [_pad_to(b.astype(jnp.float32).reshape(1, -1), (1, fp)) for _, b in params]
    b_p = jnp.stack(b_list)                                # (L+1, 1, fp) f32

    n_tiles = n_p // tile_m
    kernel = functools.partial(_sage_fused_kernel, tile_m=tile_m, num_layers=num_layers)

    out_p = pl.pallas_call(
        kernel,
        out_shape=jax.ShapeDtypeStruct((n_p, fp), jnp.float32),
        grid_spec=pltpu.PrefetchScalarGridSpec(
            num_scalar_prefetch=0,
            grid=(num_layers + 1, n_tiles),
            in_specs=[
                # A_hat row tile: pinned to block 0 during the prologue (no wasted pass
                # over A), row tile i afterwards. Constant (0,0) on the residency path.
                pl.BlockSpec((tile_m, n_p), lambda s, i: (jnp.where(s == 0, 0, i), 0)),
                # Input features: streamed tile-by-tile only during the prologue.
                pl.BlockSpec((tile_m, fp), lambda s, i: (jnp.where(s == 0, i, 0), 0)),
                # Weights used at step s (dummy block on the final step).
                pl.BlockSpec((1, fp, fp), lambda s, i: (s, 0, 0)),
                # Bias of layer s-1 (dummy block during the prologue).
                pl.BlockSpec((1, 1, fp), lambda s, i: (s, 0, 0)),
            ],
            out_specs=pl.BlockSpec((tile_m, fp), lambda s, i: (i, 0)),
            scratch_shapes=[
                pltpu.VMEM((n_p, fp), jnp.bfloat16),  # HW buffer written on even steps
                pltpu.VMEM((n_p, fp), jnp.bfloat16),  # HW buffer written on odd steps
            ],
        ),
        compiler_params=pltpu.CompilerParams(
            # Cross-layer dependency flows through the VMEM HW scratch -> both axes
            # must stay sequential.
            dimension_semantics=("arbitrary", "arbitrary"),
            vmem_limit_bytes=int(vmem_limit),
        ),
    )(a_p, h_p, w_p, b_p)

    return out_p[:N, :out_dim]


def _init_params(key, dims):
    """Glorot-uniform weights, small random bias, deterministic from key."""
    params = []
    for fin, fout in zip(dims[:-1], dims[1:]):
        key, wk, bk = jax.random.split(key, 3)
        limit = (6.0 / (fin + fout)) ** 0.5
        w = jax.random.uniform(wk, (fin, fout), jnp.float32, -limit, limit)
        b = 0.1 * jax.random.normal(bk, (fout,), jnp.float32)
        params.append((w, b))
    return params


def _build_normalized_adjacency(key, n):
    """Synthetic graph: random symmetric adjacency with self-loops, norm='both'."""
    a = (jax.random.uniform(key, (n, n)) < 0.2).astype(jnp.float32)
    a = jnp.maximum(a, a.T)
    a = jnp.maximum(a, jnp.eye(n, dtype=jnp.float32))  # self-loops -> no zero degrees
    deg = a.sum(axis=1)
    d_inv_sqrt = 1.0 / jnp.sqrt(deg)
    return a * d_inv_sqrt[:, None] * d_inv_sqrt[None, :]


def _reference_forward(a_hat, h, params):
    n_layers = len(params)
    for l, (w, b) in enumerate(params):
        h = a_hat @ (h @ w) + b[None, :]
        if l != n_layers - 1:
            h = jnp.maximum(h, 0.0)
    return h


if __name__ == "__main__":
    # Small shapes consistent with the module: num_layers=2 -> 3 GraphConv layers.
    N, IN_DIM, HIDDEN, OUT_DIM, NUM_LAYERS = 64, 32, 64, 32, 2

    key = jax.random.PRNGKey(0)
    k_adj, k_feat, k_par = jax.random.split(key, 3)

    a_hat = _build_normalized_adjacency(k_adj, N)
    h = jax.random.normal(k_feat, (N, IN_DIM), jnp.float32)

    dims = [IN_DIM] + [HIDDEN] * NUM_LAYERS + [OUT_DIM]
    params = _init_params(k_par, dims)

    out = graphsage_forward(a_hat, h, params)
    out = jax.block_until_ready(out)

    ref = _reference_forward(a_hat, h, params)
    assert out.shape == (N, OUT_DIM)
    max_err = float(jnp.max(jnp.abs(out - ref)))
    # bf16 MXU operands with f32 accumulation -> loosened tolerance vs the f32 reference.
    assert jnp.allclose(out, ref, atol=2e-2, rtol=2e-2), f"max_abs_err={max_err}"

    print("KERNEL_OK")
</pallas_src>

<mosaic_0001>
module attributes {stable_mosaic.version = 11 : i64} {
  func.func @_sage_fused_kernel(%arg0: i32, %arg1: i32, %arg2: memref<128x128xbf16, #tpu.memory_space<vmem>>, %arg3: memref<128x128xbf16, #tpu.memory_space<vmem>>, %arg4: memref<1x128x128xbf16, #tpu.memory_space<vmem>>, %arg5: memref<1x1x128xf32, #tpu.memory_space<vmem>>, %arg6: memref<128x128xf32, #tpu.memory_space<vmem>>, %arg7: memref<128x128xbf16, #tpu.memory_space<vmem>>, %arg8: memref<128x128xbf16, #tpu.memory_space<vmem>>) attributes {dimension_semantics = [#tpu.dimension_semantics<arbitrary>, #tpu.dimension_semantics<arbitrary>], iteration_bounds = array<i64: 4, 1>, scalar_prefetch = 0 : i64, scratch_operands = 2 : i64, tpu.core_type = #tpu.core_type<tc>, window_params = [{transform_indices = @transform_0, window_bounds = array<i64: 128, 128>}, {transform_indices = @transform_1, window_bounds = array<i64: 128, 128>}, {transform_indices = @transform_2, window_bounds = array<i64: 1, 128, 128>}, {transform_indices = @transform_3, window_bounds = array<i64: 1, 1, 128>}, {transform_indices = @transform_4, window_bounds = array<i64: 128, 128>}]} {
    %c128_i32 = arith.constant 128 : i32
    %0 = arith.muli %arg1, %c128_i32 : i32
    %1 = tpu.assume_multiple %0, 128 : i32
    %c0_i32 = arith.constant 0 : i32
    %2 = arith.cmpi eq, %arg0, %c0_i32 : i32
    %3 = arith.extui %2 : i1 to i32
    %c0_i32_0 = arith.constant 0 : i32
    %4 = arith.cmpi ne, %3, %c0_i32_0 : i32
    scf.if %4 {
      %c0 = arith.constant 0 : index
      %c0_11 = arith.constant 0 : index
      %25 = vector.load %arg3[%c0, %c0_11] : memref<128x128xbf16, #tpu.memory_space<vmem>>, vector<128x128xbf16>
      %c0_12 = arith.constant 0 : index
      %c0_13 = arith.constant 0 : index
      %c0_14 = arith.constant 0 : index
      %26 = vector.load %arg4[%c0_12, %c0_13, %c0_14] : memref<1x128x128xbf16, #tpu.memory_space<vmem>>, vector<1x128x128xbf16>
      %27 = vector.shape_cast %26 : vector<1x128x128xbf16> to vector<128x128xbf16>
      %cst = arith.constant dense<0.000000e+00> : vector<128x128xf32>
      %28 = tpu.matmul %25, %27, %cst {dimension_numbers = #tpu.dot_dimension_numbers<[1], [0], [0], [1], [0, 0, 1, 1], [], []>} : vector<128x128xbf16>, vector<128x128xbf16>, vector<128x128xf32> -> vector<128x128xf32>
      %29 = arith.truncf %28 : vector<128x128xf32> to vector<128x128xbf16>
      %30 = arith.index_cast %1 : i32 to index
      %c0_15 = arith.constant 0 : index
      %31 = vector.load %arg7[%30, %c0_15] : memref<128x128xbf16, #tpu.memory_space<vmem>>, vector<128x128xbf16>
      tpu.vector_store %arg7[%30, %c0_15], %29 {strides = array<i32>} : memref<128x128xbf16, #tpu.memory_space<vmem>>, vector<128x128xbf16>,
    } else {
    }
    %c2_i32 = arith.constant 2 : i32
    %c0_i32_1 = arith.constant 0 : i32
    %5 = arith.cmpi eq, %c2_i32, %c0_i32_1 : i32
    %c1_i32 = arith.constant 1 : i32
    %6 = arith.select %5, %c1_i32, %c2_i32 : i32
    %7 = arith.remsi %arg0, %6 : i32
    %c0_i32_2 = arith.constant 0 : i32
    %8 = arith.cmpi ne, %7, %c0_i32_2 : i32
    %c0_i32_3 = arith.constant 0 : i32
    %9 = arith.cmpi slt, %7, %c0_i32_3 : i32
    %c0_i32_4 = arith.constant 0 : i32
    %10 = arith.cmpi slt, %6, %c0_i32_4 : i32
    %11 = arith.xori %9, %10 : i1
    %12 = arith.andi %11, %8 : i1
    %13 = arith.addi %7, %6 : i32
    %14 = arith.select %12, %13, %7 : i32
    %c0_i32_5 = arith.constant 0 : i32
    %15 = arith.cmpi sgt, %arg0, %c0_i32_5 : i32
    %c1_i32_6 = arith.constant 1 : i32
    %16 = arith.cmpi eq, %14, %c1_i32_6 : i32
    %17 = arith.andi %15, %16 : i1
    %18 = arith.extui %17 : i1 to i32
    %c0_i32_7 = arith.constant 0 : i32
    %19 = arith.cmpi ne, %18, %c0_i32_7 : i32
    scf.if %19 {
      %c0 = arith.constant 0 : index
      %c0_11 = arith.constant 0 : index
      %25 = vector.load %arg2[%c0, %c0_11] : memref<128x128xbf16, #tpu.memory_space<vmem>>, vector<128x128xbf16>
      %c0_12 = arith.constant 0 : index
      %c0_13 = arith.constant 0 : index
      %26 = vector.load %arg7[%c0_12, %c0_13] : memref<128x128xbf16, #tpu.memory_space<vmem>>, vector<128x128xbf16>
      %cst = arith.constant dense<0.000000e+00> : vector<128x128xf32>
      %27 = tpu.matmul %25, %26, %cst {dimension_numbers = #tpu.dot_dimension_numbers<[1], [0], [0], [1], [0, 0, 1, 1], [], []>} : vector<128x128xbf16>, vector<128x128xbf16>, vector<128x128xf32> -> vector<128x128xf32>
      %c0_14 = arith.constant 0 : index
      %c0_15 = arith.constant 0 : index
      %c0_16 = arith.constant 0 : index
      %28 = vector.load %arg5[%c0_14, %c0_15, %c0_16] : memref<1x1x128xf32, #tpu.memory_space<vmem>>, vector<1x1x128xf32>
      %29 = vector.shape_cast %28 : vector<1x1x128xf32> to vector<1x128xf32>
      %30 = vector.broadcast %29 : vector<1x128xf32> to vector<128x128xf32>
      %31 = arith.addf %27, %30 : vector<128x128xf32>
      %c3_i32 = arith.constant 3 : i32
      %32 = arith.cmpi slt, %arg0, %c3_i32 : i32
      %33 = arith.extui %32 : i1 to i32
      %c0_i32_17 = arith.constant 0 : i32
      %34 = arith.cmpi ne, %33, %c0_i32_17 : i32
      scf.if %34 {
        %cst_20 = arith.constant 0.000000e+00 : f32
        %38 = vector.broadcast %cst_20 : f32 to vector<128x128xf32>
        %39 = arith.maximumf %31, %38 : vector<128x128xf32>
        %40 = arith.truncf %39 : vector<128x128xf32> to vector<128x128xbf16>
        %c0_21 = arith.constant 0 : index
        %c0_22 = arith.constant 0 : index
        %c0_23 = arith.constant 0 : index
        %41 = vector.load %arg4[%c0_21, %c0_22, %c0_23] : memref<1x128x128xbf16, #tpu.memory_space<vmem>>, vector<1x128x128xbf16>
        %42 = vector.shape_cast %41 : vector<1x128x128xbf16> to vector<128x128xbf16>
        %cst_24 = arith.constant dense<0.000000e+00> : vector<128x128xf32>
        %43 = tpu.matmul %40, %42, %cst_24 {dimension_numbers = #tpu.dot_dimension_numbers<[1], [0], [0], [1], [0, 0, 1, 1], [], []>} : vector<128x128xbf16>, vector<128x128xbf16>, vector<128x128xf32> -> vector<128x128xf32>
        %44 = arith.truncf %43 : vector<128x128xf32> to vector<128x128xbf16>
        %45 = arith.index_cast %1 : i32 to index
        %c0_25 = arith.constant 0 : index
        %46 = vector.load %arg8[%45, %c0_25] : memref<128x128xbf16, #tpu.memory_space<vmem>>, vector<128x128xbf16>
        tpu.vector_store %arg8[%45, %c0_25], %44 {strides = array<i32>} : memref<128x128xbf16, #tpu.memory_space<vmem>>, vector<128x128xbf16>,
      } else {
      }
      %c3_i32_18 = arith.constant 3 : i32
      %35 = arith.cmpi eq, %arg0, %c3_i32_18 : i32
      %36 = arith.extui %35 : i1 to i32
      %c0_i32_19 = arith.constant 0 : i32
      %37 = arith.cmpi ne, %36, %c0_i32_19 : i32
      scf.if %37 {
        %c0_20 = arith.constant 0 : index
        %c0_21 = arith.constant 0 : index
        %38 = vector.load %arg6[%c0_20, %c0_21] : memref<128x128xf32, #tpu.memory_space<vmem>>, vector<128x128xf32>
        tpu.vector_store %arg6[%c0_20, %c0_21], %31 {strides = array<i32>} : memref<128x128xf32, #tpu.memory_space<vmem>>, vector<128x128xf32>,
      } else {
      }
    } else {
    }
    %c0_i32_8 = arith.constant 0 : i32
    %20 = arith.cmpi sgt, %arg0, %c0_i32_8 : i32
    %c0_i32_9 = arith.constant 0 : i32
    %21 = arith.cmpi eq, %14, %c0_i32_9 : i32
    %22 = arith.andi %20, %21 : i1
    %23 = arith.extui %22 : i1 to i32
    %c0_i32_10 = arith.constant 0 : i32
    %24 = arith.cmpi ne, %23, %c0_i32_10 : i32
    scf.if %24 {
      %c0 = arith.constant 0 : index
      %c0_11 = arith.constant 0 : index
      %25 = vector.load %arg2[%c0, %c0_11] : memref<128x128xbf16, #tpu.memory_space<vmem>>, vector<128x128xbf16>
      %c0_12 = arith.constant 0 : index
      %c0_13 = arith.constant 0 : index
      %26 = vector.load %arg8[%c0_12, %c0_13] : memref<128x128xbf16, #tpu.memory_space<vmem>>, vector<128x128xbf16>
      %cst = arith.constant dense<0.000000e+00> : vector<128x128xf32>
      %27 = tpu.matmul %25, %26, %cst {dimension_numbers = #tpu.dot_dimension_numbers<[1], [0], [0], [1], [0, 0, 1, 1], [], []>} : vector<128x128xbf16>, vector<128x128xbf16>, vector<128x128xf32> -> vector<128x128xf32>
      %c0_14 = arith.constant 0 : index
      %c0_15 = arith.constant 0 : index
      %c0_16 = arith.constant 0 : index
      %28 = vector.load %arg5[%c0_14, %c0_15, %c0_16] : memref<1x1x128xf32, #tpu.memory_space<vmem>>, vector<1x1x128xf32>
      %29 = vector.shape_cast %28 : vector<1x1x128xf32> to vector<1x128xf32>
      %30 = vector.broadcast %29 : vector<1x128xf32> to vector<128x128xf32>
      %31 = arith.addf %27, %30 : vector<128x128xf32>
      %c3_i32 = arith.constant 3 : i32
      %32 = arith.cmpi slt, %arg0, %c3_i32 : i32
      %33 = arith.extui %32 : i1 to i32
      %c0_i32_17 = arith.constant 0 : i32
      %34 = arith.cmpi ne, %33, %c0_i32_17 : i32
      scf.if %34 {
        %cst_20 = arith.constant 0.000000e+00 : f32
        %38 = vector.broadcast %cst_20 : f32 to vector<128x128xf32>
        %39 = arith.maximumf %31, %38 : vector<128x128xf32>
        %40 = arith.truncf %39 : vector<128x128xf32> to vector<128x128xbf16>
        %c0_21 = arith.constant 0 : index
        %c0_22 = arith.constant 0 : index
        %c0_23 = arith.constant 0 : index
        %41 = vector.load %arg4[%c0_21, %c0_22, %c0_23] : memref<1x128x128xbf16, #tpu.memory_space<vmem>>, vector<1x128x128xbf16>
        %42 = vector.shape_cast %41 : vector<1x128x128xbf16> to vector<128x128xbf16>
        %cst_24 = arith.constant dense<0.000000e+00> : vector<128x128xf32>
        %43 = tpu.matmul %40, %42, %cst_24 {dimension_numbers = #tpu.dot_dimension_numbers<[1], [0], [0], [1], [0, 0, 1, 1], [], []>} : vector<128x128xbf16>, vector<128x128xbf16>, vector<128x128xf32> -> vector<128x128xf32>
        %44 = arith.truncf %43 : vector<128x128xf32> to vector<128x128xbf16>
        %45 = arith.index_cast %1 : i32 to index
        %c0_25 = arith.constant 0 : index
        %46 = vector.load %arg7[%45, %c0_25] : memref<128x128xbf16, #tpu.memory_space<vmem>>, vector<128x128xbf16>
        tpu.vector_store %arg7[%45, %c0_25], %44 {strides = array<i32>} : memref<128x128xbf16, #tpu.memory_space<vmem>>, vector<128x128xbf16>,
      } else {
      }
      %c3_i32_18 = arith.constant 3 : i32
      %35 = arith.cmpi eq, %arg0, %c3_i32_18 : i32
      %36 = arith.extui %35 : i1 to i32
      %c0_i32_19 = arith.constant 0 : i32
      %37 = arith.cmpi ne, %36, %c0_i32_19 : i32
      scf.if %37 {
        %c0_20 = arith.constant 0 : index
        %c0_21 = arith.constant 0 : index
        %38 = vector.load %arg6[%c0_20, %c0_21] : memref<128x128xf32, #tpu.memory_space<vmem>>, vector<128x128xf32>
        tpu.vector_store %arg6[%c0_20, %c0_21], %31 {strides = array<i32>} : memref<128x128xf32, #tpu.memory_space<vmem>>, vector<128x128xf32>,
      } else {
      }
    } else {
    }
    return
  }
  func.func @transform_0(%arg0: i32, %arg1: i32) -> (i32, i32) {
    %c0_i32 = arith.constant 0 : i32
    %0 = arith.cmpi eq, %arg0, %c0_i32 : i32
    %c0_i32_0 = arith.constant 0 : i32
    %1 = arith.select %0, %c0_i32_0, %arg1 : i32
    %c0_i32_1 = arith.constant 0 : i32
    %c0_i32_2 = arith.constant 0 : i32
    return %1, %c0_i32_1 : i32, i32
  }
  func.func @transform_1(%arg0: i32, %arg1: i32) -> (i32, i32) {
    %c0_i32 = arith.constant 0 : i32
    %0 = arith.cmpi eq, %arg0, %c0_i32 : i32
    %c0_i32_0 = arith.constant 0 : i32
    %1 = arith.select %0, %arg1, %c0_i32_0 : i32
    %c0_i32_1 = arith.constant 0 : i32
    %c0_i32_2 = arith.constant 0 : i32
    return %1, %c0_i32_1 : i32, i32
  }
  func.func @transform_2(%arg0: i32, %arg1: i32) -> (i32, i32, i32) {
    %c0_i32 = arith.constant 0 : i32
    %c0_i32_0 = arith.constant 0 : i32
    %c0_i32_1 = arith.constant 0 : i32
    return %arg0, %c0_i32, %c0_i32_0 : i32, i32, i32
  }
  func.func @transform_3(%arg0: i32, %arg1: i32) -> (i32, i32, i32) {
    %c0_i32 = arith.constant 0 : i32
    %c0_i32_0 = arith.constant 0 : i32
    %c0_i32_1 = arith.constant 0 : i32
    return %arg0, %c0_i32, %c0_i32_0 : i32, i32, i32
  }
  func.func @transform_4(%arg0: i32, %arg1: i32) -> (i32, i32) {
    %c0_i32 = arith.constant 0 : i32
    %c0_i32_0 = arith.constant 0 : i32
    return %arg1, %c0_i32 : i32, i32
  }
}

</mosaic_0001>

<bundles_post_ra>
// kernel: tpu_custom_call.1
= control target key start
LH: loop header
LB: loop body
LE: loop exit
PB: predicated region body
PF: predicated region fallthrough
CT: control target
= control target key end

     0   :  { %s2779_s0 = inlined_call_operand.hbm [shape: bf16[128,128], index: 0, kind: input, shape index: {}]   ;;  %s2780_s1 = inlined_call_operand.hbm [shape: bf16[128,128], index: 1, kind: input, shape index: {}]   ;;  %s2781_s2 = inlined_call_operand.hbm [shape: bf16[4,128,128], index: 2, kind: input, shape index: {}]   ;;  %s2782_s3 = inlined_call_operand.hbm [shape: f32[4,1,128], index: 3, kind: input, shape index: {}]   ;;  %s2783_s4 = inlined_call_operand.hbm [shape: f32[128,128], index: 4, kind: output, shape index: {}]  }
   0x1   :  { %2785 = sst [smem:[#allocation18_spill]] %s2779_s0 }
   0x2   :  { %2786 = sst [smem:[#allocation19_spill]] %s2780_s1 }
   0x3   :  { %9 = vsyncpa [#allocation5], 0 }
   0x4   :  { %11 = vsyncpa [#allocation5 + $0x1], 0 }
   0x5   :  { %12 = vsyncpa [#allocation8], 0 }
   0x6   :  { %14 = vsyncpa [#allocation8 + $0x1], 0 }
   0x7   :  { %15 = vsyncpa [#allocation11], 0 }
   0x8   :  { %17 = vsyncpa [#allocation11 + $0x1], 0 }
   0x9   :  { %18 = vsyncpa [#allocation6], 0  ;;  %s2445_s15 = smov 0   ;;  %s2447_s16 = smov 0  }
   0xa   :  { %s2449_s17 = smov 0   ;;  %s2451_s18 = smov 0  }
   0xb   :  { %s2453_s19 = smov 0   ;;  %s2455_s20 = smov 0  }
   0xc LB: > { %p111_p0 = scmp.eq.s32.totalorder %s2411_s20, 0  ;;  %p2133_p1 = scmp.lt.s32.totalorder %s2411_s20, 4  ;;  %s2411_s20 = sphi %s2455_s20, %s24_s20   ;;  %s2407_s19 = sphi %s2453_s19, %s2798_s19   ;;  %s2403_s18 = sphi %s2451_s18, %s2797_s18   ;;  %s2399_s17 = sphi %s2449_s17, %s2796_s17   ;;  %s2395_s16 = sphi %s2447_s16, %s2795_s16   ;;  %s2391_s15 = sphi %s2445_s15, %s2794_s15  }
   0xd   : > { %s216_s21 = sand.u32 1, %s2411_s20   ;;  %s2787_s1 = sld [smem:[#allocation19_spill]] }
   0xe   : > { %p2485_p2 = pnand %p2133_p1, %p111_p0  ;;  %s2413_s26 = smov [#allocation7]  }
   0xf   : > { %s230_s27 = sshll.u32 %s2413_s26, 4  ;;  %p1506_p3 = scmp.ge.s32.totalorder %s2411_s20, 1  ;;  %s231_s27 = int_to_ptr.vmem [resolvable:$true] %s230_s27 }
  0x10   : > { %s2490_s28 = scalar_lea.sflag [#allocation8], %s216_s21  ;;  %s2784_s29 = smov 64  }
  0x11   : > { %s2415_s30 = smov 4   ;;  %p277_p4 = scmp.lt.s32.totalorder %s2411_s20, 5 }
  0x12   : > { %s2789_s0 = sld [smem:[#allocation18_spill]]  ;;  %s2416_s9 = smov [#allocation4]  }
  0x13   : > { %s228_s24 = sshll.u32 %s2787_s1, 4  ;;  %p2502_p5 = pnand %p1506_p3, %p277_p4  ;;  %s229_s24 = int_to_ptr.hbm [resolvable:$true] %s228_s24 }
  0x14   : > { %2126 = dma.hbm_to_vmem [thread:$0]  (!%p2485_p2), %s229_s24, 1024, %s231_s27, %s2490_s28, %s2784_s29, %s2784_s29, %s2415_s30  }
  0x15   : > { %s206_s10 = sshll.u32 %s2416_s9, 4  ;;  %s2512_s11 = sadd.s32 4294967295, %s2411_s20   ;;  %s207_s10 = int_to_ptr.vmem [resolvable:$true] %s206_s10 }
  0x16   : > { %s36_s12 = sadd.s32 1, %s2407_s19  ;;  %s103_s13 = sadd.s32 1, %s2399_s17 }
  0x17   : > { %p38_p6 = scmp.ge.s32.totalorder %s36_s12, 4  ;;  %p110_p7 = scmp.ne.s32.totalorder %s2399_s17, %s2395_s16 }
  0x18   : > { %s204_s7 = sshll.u32 %s2789_s0, 4  ;;  %p116_p8 = scmp.ne.s32.totalorder %s2395_s16, %s2391_s15  ;;  %s205_s7 = int_to_ptr.hbm [resolvable:$true] %s204_s7 }
  0x19   : > { %2123 = dma.hbm_to_vmem [thread:$0]  (!%p2485_p2), %s205_s7, 1024, %s207_s10, [#allocation5], %s2784_s29, %s2784_s29, %s2415_s30  }
  0x1a   : > { %p117_p9 = scmp.eq.s32.totalorder %s2512_s11, 0  ;;  %s2800_s12 = smov (%p38_p6, %s36_s12), 0 }
  0x1b   : > { %p2525_p10 = por %p111_p0, %p110_p7  ;;  %s100_s22 = ssub.s32 %s2407_s19, %s2800_s12 }
  0x1c   : > { %p2531_p11 = por %p117_p9, %p116_p8  ;;  %s242_s15 = sand.u32 1, %s2399_s17  }
  0x1d   : > { %p101_p12 = scmp.eq.s32.totalorder %s100_s22, 0  ;;  %s1503_s23 = sshll.u32 %s242_s15, 6 }
  0x1e   : > { %s1778_s24 = sshll.u32 %s2407_s19, 6  ;;  %s244_s6 = scalar_lea.vmem [#allocation9], %s1503_s23 }
  0x1f   : > { %s2540_s25 = scalar_select %p101_p12, %s2399_s17, %s103_s13  }
  0x20   : > { %s249_s5 = scalar_lea.hbm %s2781_s2, %s1778_s24  ;;  %s252_s7 = sshll.u32 %s244_s6, 4  ;;  %s253_s7 = int_to_ptr.vmem [resolvable:$true] %s252_s7 }
  0x21   : > { %s250_s9 = sshll.u32 %s249_s5, 4  ;;  %p2127_p13 = pnand %p2133_p1, %p2525_p10  ;;  %s251_s9 = int_to_ptr.hbm [resolvable:$true] %s250_s9 }
  0x22   : > { %s268_s22 = scalar_lea.hbm %s2782_s3, %s2407_s19  ;;  %s2793_s0 = smov 64  }
  0x23   : > { %2129 = dma.hbm_to_vmem [thread:$0]  (!%p2127_p13), %s251_s9, 1024, %s253_s7, %s2490_s28, %s2793_s0, %s2793_s0, %s2415_s30  }
  0x24   : > { %s270_s13 = sshll.u32 %s268_s22, 4  ;;  %s265_s1 = scalar_lea.vmem [#allocation10], %s242_s15  ;;  %s271_s13 = int_to_ptr.hbm [resolvable:$true] %s270_s13 }
  0x25   : > { %s272_s26 = sshll.u32 %s265_s1, 4  ;;  %s263_s23 = scalar_lea.sflag [#allocation11], %s242_s15  ;;  %s273_s26 = int_to_ptr.vmem [resolvable:$true] %s272_s26 }
  0x26   : > { %2132 = dma.hbm_to_vmem [thread:$0]  (!%p2127_p13), %s271_s13, 16, %s273_s26, %s263_s23  }
  0x27   : > { %281 = sbr.rel (%p2502_p5) target bundleno = 1098 (0x44a), region = 36 }
  0x2c   : > { %2370 = dma.done.wait (%p117_p9), [#allocation5], 1024  }
  0x2d   : > { %2372 = vsyncadd (%p117_p9), [#allocation5], 4294966272  ;;  %s293_s29 = sand.u32 1, %s2512_s11  }
  0x2e   : > { %s294_s0 = scalar_lea.sflag [#allocation8], %s293_s29 }
  0x2f   : > { %2374 = dma.done.wait (%p117_p9), %s294_s0, 1024  }
  0x30   : > { %2376 = vsyncadd (%p117_p9), %s294_s0, 4294966272  ;;  %s2569_s1 = sand.u32 1, %s2395_s16  }
  0x31   : > { %s1509_s28 = sshll.u32 %s2569_s1, 6 }
  0x32   : > { %s2572_s30 = scalar_lea.vmem [#allocation9], %s1509_s28 }
  0x33   : > { %2378 = dma.done.wait (%p2531_p11), %s294_s0, 1024  }
  0x34   : > { %2380 = vsyncadd (%p2531_p11), %s294_s0, 4294966272  ;;  %s314_s8 = scalar_lea.sflag [#allocation11], %s2569_s1  ;;  %s316_s14 = scalar_lea.vmem [#allocation10], %s2569_s1 }
  0x35   : > { %2382 = dma.done.wait (%p2531_p11), %s314_s8, 16  }
  0x36   : > { %2384 = vsyncadd (%p2531_p11), %s314_s8, 4294967280  ;;  %p1510_p0 = scmp.ne.s32.totalorder %s2403_s18, 0 }
  0x38   : > { %362 = sbr.rel (%p1510_p0) target bundleno = 254 (0xfe), region = 56 }
  0x3d   : > { %v1794_v0 = vld [vmem:[%s2572_s30 + $0x38] sm:$0xff]  ;;  %v1793_v1 = vld [vmem:[%s2572_s30 + $0x30] sm:$0xff]  ;;  %v1792_v2 = vld [vmem:[%s2572_s30 + $0x28] sm:$0xff] }
  0x3e   : > { %491 = vmatpush.bf16.msra.mxu0 %v1794_v0  ;;  %1984 = vmatpush.bf16.msra.mxu1 %v1794_v0  ;;  %v1791_v3 = vld [vmem:[%s2572_s30 + $0x20] sm:$0xff]  ;;  %v1790_v4 = vld [vmem:[%s2572_s30 + $0x18] sm:$0xff]  ;;  %v1789_v5 = vld [vmem:[%s2572_s30 + $0x10] sm:$0xff] }
  0x3f   : > { %1985 = vmatpush.bf16.msra.mxu2 %v1794_v0  ;;  %1986 = vmatpush.bf16.msra.mxu3 %v1794_v0  ;;  %v1788_v6 = vld [vmem:[%s2572_s30 + $0x8] sm:$0xff]  ;;  %v1787_v7 = vld [vmem:[%s2572_s30] sm:$0xff]  ;;  %v1781_v9 = vld [vmem:[#allocation7 + $0x10] sm:$0xff] }
  0x40   : > { %v1779_v8 = vld [vmem:[#allocation7] sm:$0xff]  ;;  %v1785_v11 = vld [vmem:[#allocation7 + $0x30] sm:$0xff]  ;;  %v1780_v12 = vld [vmem:[#allocation7 + $0x8] sm:$0xff] }
  0x41   : > { %v1783_v10 = vld [vmem:[#allocation7 + $0x20] sm:$0xff]  ;;  %v1782_v13 = vld [vmem:[#allocation7 + $0x18] sm:$0xff]  ;;  %v1784_v14 = vld [vmem:[#allocation7 + $0x28] sm:$0xff] }
  0x42   : > { %492 = vmatpush.bf16.msra.mxu0 %v1793_v1  ;;  %1987 = vmatpush.bf16.msra.mxu1 %v1793_v1  ;;  %v1786_v15 = vld [vmem:[#allocation7 + $0x38] sm:$0xff] }
  0x43   : > { %1988 = vmatpush.bf16.msra.mxu2 %v1793_v1  ;;  %1989 = vmatpush.bf16.msra.mxu3 %v1793_v1 }
  0x46   : > { %493 = vmatpush.bf16.msra.mxu0 %v1792_v2  ;;  %1990 = vmatpush.bf16.msra.mxu1 %v1792_v2 }
  0x47   : > { %1991 = vmatpush.bf16.msra.mxu2 %v1792_v2  ;;  %1992 = vmatpush.bf16.msra.mxu3 %v1792_v2 }
  0x4a   : > { %494 = vmatpush.bf16.msra.mxu0 %v1791_v3  ;;  %1993 = vmatpush.bf16.msra.mxu1 %v1791_v3 }
  0x4b   : > { %1994 = vmatpush.bf16.msra.mxu2 %v1791_v3  ;;  %1995 = vmatpush.bf16.msra.mxu3 %v1791_v3 }
  0x4e   : > { %495 = vmatpush.bf16.msra.mxu0 %v1790_v4  ;;  %1996 = vmatpush.bf16.msra.mxu1 %v1790_v4 }
  0x4f   : > { %1997 = vmatpush.bf16.msra.mxu2 %v1790_v4  ;;  %1998 = vmatpush.bf16.msra.mxu3 %v1790_v4 }
  0x52   : > { %496 = vmatpush.bf16.msra.mxu0 %v1789_v5  ;;  %1999 = vmatpush.bf16.msra.mxu1 %v1789_v5 }
  0x53   : > { %2000 = vmatpush.bf16.msra.mxu2 %v1789_v5  ;;  %2001 = vmatpush.bf16.msra.mxu3 %v1789_v5 }
  0x56   : > { %497 = vmatpush.bf16.msra.mxu0 %v1788_v6  ;;  %2002 = vmatpush.bf16.msra.mxu1 %v1788_v6 }
  0x57   : > { %2003 = vmatpush.bf16.msra.mxu2 %v1788_v6  ;;  %2004 = vmatpush.bf16.msra.mxu3 %v1788_v6 }
  0x5a   : > { %498 = vmatpush.bf16.msra.mxu0 %v1787_v7  ;;  %2005 = vmatpush.bf16.msra.mxu1 %v1787_v7 }
  0x5b   : > { %2006 = vmatpush.bf16.msra.mxu2 %v1787_v7  ;;  %2007 = vmatpush.bf16.msra.mxu3 %v1787_v7 }
  0x5d   : > { %499 = vmatmul.bf16.vlgmr.msra.gmra.mxu0 %v1779_v8  ;;  %509 = vmatmul.bf16.vlgmr.msra.gmra.mxu1 %v1781_v9 }
  0x5e   : > { %519 = vmatmul.bf16.vlgmr.msra.gmra.mxu2 %v1783_v10  ;;  %529 = vmatmul.bf16.vlgmr.msra.gmra.mxu3 %v1785_v11 }
  0x6d   : > { %504 = vmatmul.bf16.gmra.mxu0 %v1780_v12  ;;  %514 = vmatmul.bf16.gmra.mxu1 %v1782_v13 }
  0x6e   : > { %524 = vmatmul.bf16.gmra.mxu2 %v1784_v14  ;;  %534 = vmatmul.bf16.gmra.mxu3 %v1786_v15 }
  0xda   : > { %v500_v16 = vpop.f32.mrf.mxu0  ;;  %v510_v17 = vpop.f32.mrf.mxu1 }
  0xe1   : > { %v520_v18 = vpop.f32.mrf.mxu2  ;;  %v530_v19 = vpop.f32.mrf.mxu3 }
  0xe2   : > { %v502_v20 = vpop.f32.mrf.mxu0  ;;  %v512_v21 = vpop.f32.mrf.mxu1 }
  0xe3   : > { %v1846_v22 = vpack.c.bf16 %v502_v20, %v500_v16  ;;  %v1856_v23 = vpack.c.bf16 %v512_v21, %v510_v17 }
  0xe5   : > { %1847 = vst [vmem:[#allocation2 + $0x30] sm:$0xff] %v1846_v22  }
  0xe6   : > { %1964 = vst [vmem:[#allocation2 + $0x18] sm:$0xff] %v1856_v23  }
  0xe9   : > { %v522_v24 = vpop.f32.mrf.mxu2  ;;  %v532_v25 = vpop.f32.mrf.mxu3 }
  0xea   : > { %v1866_v26 = vpack.c.bf16 %v522_v24, %v520_v18  ;;  %v1876_v27 = vpack.c.bf16 %v532_v25, %v530_v19  ;;  %v505_v28 = vpop.f32.mrf.mxu0  ;;  %v515_v29 = vpop.f32.mrf.mxu1 }
  0xec   : > { %1966 = vst [vmem:[#allocation2 + $0x8] sm:$0xff] %v1866_v26  }
  0xed   : > { %1968 = vst [vmem:[#allocation2 + $0x28] sm:$0xff] %v1876_v27  }
  0xf1   : > { %v525_v30 = vpop.f32.mrf.mxu2  ;;  %v535_v31 = vpop.f32.mrf.mxu3 }
  0xf2   : > { %v507_v32 = vpop.f32.mrf.mxu0  ;;  %v517_v33 = vpop.f32.mrf.mxu1 }
  0xf3   : > { %v1851_v34 = vpack.c.bf16 %v507_v32, %v505_v28  ;;  %v1861_v35 = vpack.c.bf16 %v517_v33, %v515_v29 }
  0xf5   : > { %1963 = vst [vmem:[#allocation2] sm:$0xff] %v1851_v34  }
  0xf6   : > { %1965 = vst [vmem:[#allocation2 + $0x10] sm:$0xff] %v1861_v35  }
  0xf9   : > { %v527_v36 = vpop.f32.mrf.mxu2  ;;  %v537_v37 = vpop.f32.mrf.mxu3 }
  0xfa   : > { %v1871_v38 = vpack.c.bf16 %v527_v36, %v525_v30  ;;  %v1881_v39 = vpack.c.bf16 %v537_v37, %v535_v31 }
  0xfc   : > { %1967 = vst [vmem:[#allocation2 + $0x20] sm:$0xff] %v1871_v38  }
  0xfd   : > { %1969 = vst [vmem:[#allocation2 + $0x38] sm:$0xff] %v1881_v39  }
  0xfe PF: > { %p576_p1 = scmp.lt.s32.totalorder %s2403_s18, 0  ;;  %s577_s21 = ssub.s32 0, %s2403_s18 }
  0xff   : > { %s1575_s15 = smin.u32 %s2403_s18, %s577_s21  ;;  %p588_p3 = scmp.gt.s32.totalorder %s2403_s18, 0 }
 0x100   : > { %s579_s24 = sand.u32 1, %s1575_s15  }
 0x101   : > { %s580_s27 = ssub.s32 0, %s579_s24 }
 0x102   : > { %s2802_s27 = smov (!%p576_p1, %s580_s27), %s579_s24 }
 0x103   : > { %p1577_p2 = scmp.lt.s32.totalorder %s2802_s27, 0  ;;  %s586_s5 = sadd.s32 2, %s2802_s27 }
 0x105   : > { %s2804_s5 = smov (!%p1577_p2, %s586_s5), %s2802_s27 }
 0x106   : > { %p589_p4 = scmp.eq.s32.totalorder %s2804_s5, 1 }
 0x108   : > { %p590_p5 = pnand %p589_p4, %p588_p3 }
 0x109   : > { %p1642_p6 = scmp.ge.s32.totalorder (!%p590_p5), %s2403_s18, 3 }
 0x10a   : > { %593 = sbr.rel (%p590_p5) target bundleno = 677 (0x2a5), region = 60 }
 0x10f   : > { %v1810_v40 = vld [vmem:[#allocation2 + $0x38] sm:$0xff]  ;;  %v1809_v41 = vld [vmem:[#allocation2 + $0x28] sm:$0xff]  ;;  %v1808_v42 = vld [vmem:[#allocation2 + $0x20] sm:$0xff] }
 0x110   : > { %726 = vmatpush.bf16.msra.mxu0 %v1810_v40  ;;  %2008 = vmatpush.bf16.msra.mxu1 %v1810_v40  ;;  %v1807_v43 = vld [vmem:[#allocation2 + $0x8] sm:$0xff]  ;;  %v1806_v44 = vld [vmem:[#allocation2 + $0x10] sm:$0xff]  ;;  %v1805_v45 = vld [vmem:[#allocation2 + $0x18] sm:$0xff] }
 0x111   : > { %2009 = vmatpush.bf16.msra.mxu2 %v1810_v40  ;;  %2010 = vmatpush.bf16.msra.mxu3 %v1810_v40  ;;  %v1804_v46 = vld [vmem:[#allocation2] sm:$0xff]  ;;  %v1803_v47 = vld [vmem:[#allocation2 + $0x30] sm:$0xff]  ;;  %v1796_v52 = vld [vmem:[#allocation4 + $0x8] sm:$0xff] }
 0x112   : > { %v1795_v48 = vld [vmem:[#allocation4] sm:$0xff]  ;;  %v1797_v49 = vld [vmem:[#allocation4 + $0x10] sm:$0xff]  ;;  %v1798_v53 = vld [vmem:[#allocation4 + $0x18] sm:$0xff] }
 0x113   : > { %v1799_v50 = vld [vmem:[#allocation4 + $0x20] sm:$0xff]  ;;  %v1801_v51 = vld [vmem:[#allocation4 + $0x30] sm:$0xff]  ;;  %v1800_v54 = vld [vmem:[#allocation4 + $0x28] sm:$0xff] }
 0x114   : > { %727 = vmatpush.bf16.msra.mxu0 %v1809_v41  ;;  %2011 = vmatpush.bf16.msra.mxu1 %v1809_v41  ;;  %v1802_v55 = vld [vmem:[#allocation4 + $0x38] sm:$0xff]  ;;  %v2195_v56 = vld [vmem:[%s316_s14] ss:$0 sm:$0xff] }
 0x115   : > { %2012 = vmatpush.bf16.msra.mxu2 %v1809_v41  ;;  %2013 = vmatpush.bf16.msra.mxu3 %v1809_v41 }
 0x118   : > { %728 = vmatpush.bf16.msra.mxu0 %v1808_v42  ;;  %2014 = vmatpush.bf16.msra.mxu1 %v1808_v42 }
 0x119   : > { %2015 = vmatpush.bf16.msra.mxu2 %v1808_v42  ;;  %2016 = vmatpush.bf16.msra.mxu3 %v1808_v42 }
 0x11c   : > { %729 = vmatpush.bf16.msra.mxu0 %v1807_v43  ;;  %2017 = vmatpush.bf16.msra.mxu1 %v1807_v43 }
 0x11d   : > { %2018 = vmatpush.bf16.msra.mxu2 %v1807_v43  ;;  %2019 = vmatpush.bf16.msra.mxu3 %v1807_v43 }
 0x120   : > { %730 = vmatpush.bf16.msra.mxu0 %v1806_v44  ;;  %2020 = vmatpush.bf16.msra.mxu1 %v1806_v44 }
 0x121   : > { %2021 = vmatpush.bf16.msra.mxu2 %v1806_v44  ;;  %2022 = vmatpush.bf16.msra.mxu3 %v1806_v44 }
 0x124   : > { %731 = vmatpush.bf16.msra.mxu0 %v1805_v45  ;;  %2023 = vmatpush.bf16.msra.mxu1 %v1805_v45 }
 0x125   : > { %2024 = vmatpush.bf16.msra.mxu2 %v1805_v45  ;;  %2025 = vmatpush.bf16.msra.mxu3 %v1805_v45 }
 0x128   : > { %732 = vmatpush.bf16.msra.mxu0 %v1804_v46  ;;  %2026 = vmatpush.bf16.msra.mxu1 %v1804_v46 }
 0x129   : > { %2027 = vmatpush.bf16.msra.mxu2 %v1804_v46  ;;  %2028 = vmatpush.bf16.msra.mxu3 %v1804_v46 }
 0x12c   : > { %733 = vmatpush.bf16.msra.mxu0 %v1803_v47  ;;  %2029 = vmatpush.bf16.msra.mxu1 %v1803_v47 }
 0x12d   : > { %2030 = vmatpush.bf16.msra.mxu2 %v1803_v47  ;;  %2031 = vmatpush.bf16.msra.mxu3 %v1803_v47 }
 0x12f   : > { %734 = vmatmul.bf16.vlgmr.msra.gmra.mxu0 %v1795_v48  ;;  %744 = vmatmul.bf16.vlgmr.msra.gmra.mxu1 %v1797_v49 }
 0x130   : > { %754 = vmatmul.bf16.vlgmr.msra.gmra.mxu2 %v1799_v50  ;;  %764 = vmatmul.bf16.vlgmr.msra.gmra.mxu3 %v1801_v51 }
 0x13f   : > { %739 = vmatmul.bf16.gmra.mxu0 %v1796_v52  ;;  %749 = vmatmul.bf16.gmra.mxu1 %v1798_v53 }
 0x140   : > { %759 = vmatmul.bf16.gmra.mxu2 %v1800_v54  ;;  %769 = vmatmul.bf16.gmra.mxu3 %v1802_v55 }
 0x1ac   : > { %v735_v57 = vpop.f32.mrf.mxu0  ;;  %v745_v58 = vpop.f32.mrf.mxu1 }
 0x1ad   : > { %v2604_v59 = vadd.f32 %v2195_v56, %v735_v57  ;;  %v2606_v60 = vadd.f32 %v2195_v56, %v745_v58 }
 0x1b3   : > { %v755_v61 = vpop.f32.mrf.mxu2  ;;  %v765_v62 = vpop.f32.mrf.mxu3 }
 0x1b4   : > { %v2608_v63 = vadd.f32 %v2195_v56, %v755_v61  ;;  %v2610_v0 = vadd.f32 %v2195_v56, %v765_v62  ;;  %v737_v1 = vpop.f32.mrf.mxu0  ;;  %v747_v2 = vpop.f32.mrf.mxu1 }
 0x1b5   : > { %v2612_v3 = vadd.f32 %v2195_v56, %v737_v1  ;;  %v2614_v4 = vadd.f32 %v2195_v56, %v747_v2 }
 0x1bb   : > { %v757_v5 = vpop.f32.mrf.mxu2  ;;  %v767_v6 = vpop.f32.mrf.mxu3 }
 0x1bc   : > { %v2616_v7 = vadd.f32 %v2195_v56, %v757_v5  ;;  %v2618_v8 = vadd.f32 %v2195_v56, %v767_v6  ;;  %v740_v9 = vpop.f32.mrf.mxu0  ;;  %v750_v10 = vpop.f32.mrf.mxu1 }
 0x1bd   : > { %v2620_v11 = vadd.f32 %v2195_v56, %v740_v9  ;;  %v2622_v12 = vadd.f32 %v2195_v56, %v750_v10 }
 0x1c3   : > { %v760_v13 = vpop.f32.mrf.mxu2  ;;  %v770_v14 = vpop.f32.mrf.mxu3 }
 0x1c4   : > { %v2624_v15 = vadd.f32 %v2195_v56, %v760_v13  ;;  %v2626_v16 = vadd.f32 %v2195_v56, %v770_v14  ;;  %v742_v17 = vpop.f32.mrf.mxu0  ;;  %v752_v18 = vpop.f32.mrf.mxu1 }
 0x1c5   : > { %v2628_v19 = vadd.f32 %v2195_v56, %v742_v17  ;;  %v2630_v20 = vadd.f32 %v2195_v56, %v752_v18 }
 0x1c8   : > { %778 = sbr.rel (%p1642_p6) target bundleno = 654 (0x28e), region = 64 }
 0x1cb   : > { %v762_v21 = vpop.f32.mrf.mxu2  ;;  %v772_v22 = vpop.f32.mrf.mxu3 }
 0x1cc   : > { %v2632_v23 = vadd.f32 %v2195_v56, %v762_v21  ;;  %v2634_v24 = vadd.f32 %v2195_v56, %v772_v22 }
 0x1cd   : > { %v1818_v25 = vld [vmem:[%s2572_s30 + $0x38] sm:$0xff]  ;;  %v1817_v26 = vld [vmem:[%s2572_s30 + $0x30] sm:$0xff]  ;;  %v1816_v27 = vld [vmem:[%s2572_s30 + $0x28] sm:$0xff]  ;;  %v779_v32 = vmax.f32 %v2604_v59, 0.0  ;;  %v780_v33 = vmax.f32 %v2612_v3, 0.0  ;;  %v783_v34 = vmax.f32 %v2606_v60, 0.0 }
 0x1ce   : > { %867 = vmatpush.bf16.msra.mxu0 %v1818_v25  ;;  %2032 = vmatpush.bf16.msra.mxu1 %v1818_v25  ;;  %v1815_v28 = vld [vmem:[%s2572_s30 + $0x20] sm:$0xff]  ;;  %v1814_v29 = vld [vmem:[%s2572_s30 + $0x18] sm:$0xff]  ;;  %v1813_v30 = vld [vmem:[%s2572_s30 + $0x10] sm:$0xff]  ;;  %v784_v35 = vmax.f32 %v2614_v4, 0.0  ;;  %v787_v37 = vmax.f32 %v2608_v63, 0.0  ;;  %v788_v38 = vmax.f32 %v2616_v7, 0.0 }
 0x1cf   : > { %2033 = vmatpush.bf16.msra.mxu2 %v1818_v25  ;;  %2034 = vmatpush.bf16.msra.mxu3 %v1818_v25  ;;  %v1812_v31 = vld [vmem:[%s2572_s30 + $0x8] sm:$0xff]  ;;  %v1811_v36 = vld [vmem:[%s2572_s30] sm:$0xff]  ;;  %v791_v39 = vmax.f32 %v2610_v0, 0.0  ;;  %v792_v40 = vmax.f32 %v2618_v8, 0.0  ;;  %v795_v41 = vpack.c.bf16 %v780_v33, %v779_v32  ;;  %v781_v45 = vmax.f32 %v2620_v11, 0.0 }
 0x1d0   : > { %v797_v42 = vpack.c.bf16 %v784_v35, %v783_v34  ;;  %v799_v43 = vpack.c.bf16 %v788_v38, %v787_v37  ;;  %v782_v46 = vmax.f32 %v2628_v19, 0.0  ;;  %v785_v47 = vmax.f32 %v2622_v12, 0.0 }
 0x1d1   : > { %v801_v44 = vpack.c.bf16 %v792_v40, %v791_v39  ;;  %v786_v48 = vmax.f32 %v2630_v20, 0.0  ;;  %v789_v49 = vmax.f32 %v2624_v15, 0.0  ;;  %v790_v50 = vmax.f32 %v2632_v23, 0.0 }
 0x1d2   : > { %868 = vmatpush.bf16.msra.mxu0 %v1817_v26  ;;  %2035 = vmatpush.bf16.msra.mxu1 %v1817_v26  ;;  %v793_v51 = vmax.f32 %v2626_v16, 0.0  ;;  %v794_v52 = vmax.f32 %v2634_v24, 0.0  ;;  %v796_v53 = vpack.c.bf16 %v782_v46, %v781_v45 }
 0x1d3   : > { %2036 = vmatpush.bf16.msra.mxu2 %v1817_v26  ;;  %2037 = vmatpush.bf16.msra.mxu3 %v1817_v26  ;;  %v798_v54 = vpack.c.bf16 %v786_v48, %v785_v47  ;;  %v800_v55 = vpack.c.bf16 %v790_v50, %v789_v49 }
 0x1d4   : > { %v802_v56 = vpack.c.bf16 %v794_v52, %v793_v51 }
 0x1d6   : > { %869 = vmatpush.bf16.msra.mxu0 %v1816_v27  ;;  %2038 = vmatpush.bf16.msra.mxu1 %v1816_v27 }
 0x1d7   : > { %2039 = vmatpush.bf16.msra.mxu2 %v1816_v27  ;;  %2040 = vmatpush.bf16.msra.mxu3 %v1816_v27 }
 0x1da   : > { %870 = vmatpush.bf16.msra.mxu0 %v1815_v28  ;;  %2041 = vmatpush.bf16.msra.mxu1 %v1815_v28 }
 0x1db   : > { %2042 = vmatpush.bf16.msra.mxu2 %v1815_v28  ;;  %2043 = vmatpush.bf16.msra.mxu3 %v1815_v28 }
 0x1de   : > { %871 = vmatpush.bf16.msra.mxu0 %v1814_v29  ;;  %2044 = vmatpush.bf16.msra.mxu1 %v1814_v29 }
 0x1df   : > { %2045 = vmatpush.bf16.msra.mxu2 %v1814_v29  ;;  %2046 = vmatpush.bf16.msra.mxu3 %v1814_v29 }
 0x1e2   : > { %872 = vmatpush.bf16.msra.mxu0 %v1813_v30  ;;  %2047 = vmatpush.bf16.msra.mxu1 %v1813_v30 }
 0x1e3   : > { %2048 = vmatpush.bf16.msra.mxu2 %v1813_v30  ;;  %2049 = vmatpush.bf16.msra.mxu3 %v1813_v30 }
 0x1e6   : > { %873 = vmatpush.bf16.msra.mxu0 %v1812_v31  ;;  %2050 = vmatpush.bf16.msra.mxu1 %v1812_v31 }
 0x1e7   : > { %2051 = vmatpush.bf16.msra.mxu2 %v1812_v31  ;;  %2052 = vmatpush.bf16.msra.mxu3 %v1812_v31 }
 0x1ea   : > { %874 = vmatpush.bf16.msra.mxu0 %v1811_v36  ;;  %2053 = vmatpush.bf16.msra.mxu1 %v1811_v36 }
 0x1eb   : > { %2054 = vmatpush.bf16.msra.mxu2 %v1811_v36  ;;  %2055 = vmatpush.bf16.msra.mxu3 %v1811_v36 }
 0x1ed   : > { %875 = vmatmul.bf16.vlgmr.msra.gmra.mxu0 %v795_v41  ;;  %885 = vmatmul.bf16.vlgmr.msra.gmra.mxu1 %v797_v42 }
 0x1ee   : > { %895 = vmatmul.bf16.vlgmr.msra.gmra.mxu2 %v799_v43  ;;  %905 = vmatmul.bf16.vlgmr.msra.gmra.mxu3 %v801_v44 }
 0x1fd   : > { %880 = vmatmul.bf16.gmra.mxu0 %v796_v53  ;;  %890 = vmatmul.bf16.gmra.mxu1 %v798_v54 }
 0x1fe   : > { %900 = vmatmul.bf16.gmra.mxu2 %v800_v55  ;;  %910 = vmatmul.bf16.gmra.mxu3 %v802_v56 }
 0x26a   : > { %v876_v57 = vpop.f32.mrf.mxu0  ;;  %v886_v58 = vpop.f32.mrf.mxu1 }
 0x271   : > { %v896_v61 = vpop.f32.mrf.mxu2  ;;  %v906_v62 = vpop.f32.mrf.mxu3 }
 0x272   : > { %v878_v1 = vpop.f32.mrf.mxu0  ;;  %v888_v2 = vpop.f32.mrf.mxu1 }
 0x273   : > { %v1886_v5 = vpack.c.bf16 %v878_v1, %v876_v57  ;;  %v1896_v6 = vpack.c.bf16 %v888_v2, %v886_v58 }
 0x275   : > { %1887 = vst [vmem:[#allocation3] sm:$0xff] %v1886_v5  }
 0x276   : > { %1971 = vst [vmem:[#allocation3 + $0x10] sm:$0xff] %v1896_v6  }
 0x279   : > { %v898_v9 = vpop.f32.mrf.mxu2  ;;  %v908_v10 = vpop.f32.mrf.mxu3 }
 0x27a   : > { %v1906_v13 = vpack.c.bf16 %v898_v9, %v896_v61  ;;  %v1916_v14 = vpack.c.bf16 %v908_v10, %v906_v62  ;;  %v881_v17 = vpop.f32.mrf.mxu0  ;;  %v891_v18 = vpop.f32.mrf.mxu1 }
 0x27c   : > { %1973 = vst [vmem:[#allocation3 + $0x28] sm:$0xff] %v1906_v13  }
 0x27d   : > { %1975 = vst [vmem:[#allocation3 + $0x30] sm:$0xff] %v1916_v14  }
 0x281   : > { %v901_v21 = vpop.f32.mrf.mxu2  ;;  %v911_v22 = vpop.f32.mrf.mxu3 }
 0x282   : > { %v883_v25 = vpop.f32.mrf.mxu0  ;;  %v893_v26 = vpop.f32.mrf.mxu1 }
 0x283   : > { %v1891_v27 = vpack.c.bf16 %v883_v25, %v881_v17  ;;  %v1901_v28 = vpack.c.bf16 %v893_v26, %v891_v18 }
 0x285   : > { %1970 = vst [vmem:[#allocation3 + $0x18] sm:$0xff] %v1891_v27  }
 0x286   : > { %1972 = vst [vmem:[#allocation3 + $0x20] sm:$0xff] %v1901_v28  }
 0x289   : > { %v903_v29 = vpop.f32.mrf.mxu2  ;;  %v913_v30 = vpop.f32.mrf.mxu3 }
 0x28a   : > { %v1911_v31 = vpack.c.bf16 %v903_v29, %v901_v21  ;;  %v1921_v32 = vpack.c.bf16 %v913_v30, %v911_v22 }
 0x28c   : > { %1974 = vst [vmem:[#allocation3 + $0x8] sm:$0xff] %v1911_v31  }
 0x28d   : > { %1976 = vst [vmem:[#allocation3 + $0x38] sm:$0xff] %v1921_v32  }
 0x28e PF: > { %p1675_p7 = scmp.ne.s32.totalorder %s2403_s18, 3 }
 0x290   : > { %955 = sbr.rel (%p1675_p7) target bundleno = 677 (0x2a5), region = 68 }
 0x295   : > { %956 = vst [vmem:[#allocation12] sm:$0xff] %v2604_v59 }
 0x296   : > { %957 = vst [vmem:[#allocation12 + $0x8] sm:$0xff] %v2612_v3 }
 0x297   : > { %958 = vst [vmem:[#allocation12 + $0x10] sm:$0xff] %v2620_v11 }
 0x298   : > { %959 = vst [vmem:[#allocation12 + $0x18] sm:$0xff] %v2628_v19 }
 0x299   : > { %960 = vst [vmem:[#allocation12 + $0x20] sm:$0xff] %v2606_v60 }
 0x29a   : > { %961 = vst [vmem:[#allocation12 + $0x28] sm:$0xff] %v2614_v4 }
 0x29b   : > { %962 = vst [vmem:[#allocation12 + $0x30] sm:$0xff] %v2622_v12 }
 0x29c   : > { %963 = vst [vmem:[#allocation12 + $0x38] sm:$0xff] %v2630_v20 }
 0x29d   : > { %964 = vst [vmem:[#allocation12 + $0x40] sm:$0xff] %v2608_v63 }
 0x29e   : > { %965 = vst [vmem:[#allocation12 + $0x48] sm:$0xff] %v2616_v7 }
 0x29f   : > { %966 = vst [vmem:[#allocation12 + $0x50] sm:$0xff] %v2624_v15 }
 0x2a0   : > { %967 = vst [vmem:[#allocation12 + $0x58] sm:$0xff] %v2632_v23 }
 0x2a1   : > { %968 = vst [vmem:[#allocation12 + $0x60] sm:$0xff] %v2610_v0 }
 0x2a2   : > { %969 = vst [vmem:[#allocation12 + $0x68] sm:$0xff] %v2618_v8 }
 0x2a3   : > { %970 = vst [vmem:[#allocation12 + $0x70] sm:$0xff] %v2626_v16 }
 0x2a4   : > { %971 = vst [vmem:[#allocation12 + $0x78] sm:$0xff] %v2634_v24 }
 0x2a5 PF: > { %p972_p8 = scmp.eq.s32.totalorder %s2804_s5, 0 }
 0x2a7   : > { %p973_p9 = pnand %p972_p8, %p588_p3 }
 0x2a8   : > { %p1740_p10 = scmp.ge.s32.totalorder (!%p973_p9), %s2403_s18, 3 }
 0x2a9   : > { %976 = sbr.rel (%p973_p9) target bundleno = 1092 (0x444), region = 72 }
 0x2ae   : > { %v1834_v59 = vld [vmem:[#allocation3 + $0x38] sm:$0xff]  ;;  %v1833_v60 = vld [vmem:[#allocation3 + $0x30] sm:$0xff]  ;;  %v1832_v63 = vld [vmem:[#allocation3 + $0x8] sm:$0xff] }
 0x2af   : > { %1109 = vmatpush.bf16.msra.mxu0 %v1834_v59  ;;  %2056 = vmatpush.bf16.msra.mxu1 %v1834_v59  ;;  %v1831_v0 = vld [vmem:[#allocation3 + $0x28] sm:$0xff]  ;;  %v1830_v3 = vld [vmem:[#allocation3 + $0x20] sm:$0xff]  ;;  %v1829_v4 = vld [vmem:[#allocation3 + $0x10] sm:$0xff] }
 0x2b0   : > { %2057 = vmatpush.bf16.msra.mxu2 %v1834_v59  ;;  %2058 = vmatpush.bf16.msra.mxu3 %v1834_v59  ;;  %v1828_v7 = vld [vmem:[#allocation3 + $0x18] sm:$0xff]  ;;  %v1827_v8 = vld [vmem:[#allocation3] sm:$0xff]  ;;  %v1821_v12 = vld [vmem:[#allocation4 + $0x10] sm:$0xff] }
 0x2b1   : > { %v1819_v11 = vld [vmem:[#allocation4] sm:$0xff]  ;;  %v1825_v16 = vld [vmem:[#allocation4 + $0x30] sm:$0xff]  ;;  %v1820_v19 = vld [vmem:[#allocation4 + $0x8] sm:$0xff] }
 0x2b2   : > { %v1823_v15 = vld [vmem:[#allocation4 + $0x20] sm:$0xff]  ;;  %v1822_v20 = vld [vmem:[#allocation4 + $0x18] sm:$0xff]  ;;  %v1824_v23 = vld [vmem:[#allocation4 + $0x28] sm:$0xff] }
 0x2b3   : > { %1110 = vmatpush.bf16.msra.mxu0 %v1833_v60  ;;  %2059 = vmatpush.bf16.msra.mxu1 %v1833_v60  ;;  %v1826_v24 = vld [vmem:[#allocation4 + $0x38] sm:$0xff]  ;;  %v2196_v33 = vld [vmem:[%s316_s14] ss:$0 sm:$0xff] }
 0x2b4   : > { %2060 = vmatpush.bf16.msra.mxu2 %v1833_v60  ;;  %2061 = vmatpush.bf16.msra.mxu3 %v1833_v60 }
 0x2b7   : > { %1111 = vmatpush.bf16.msra.mxu0 %v1832_v63  ;;  %2062 = vmatpush.bf16.msra.mxu1 %v1832_v63 }
 0x2b8   : > { %2063 = vmatpush.bf16.msra.mxu2 %v1832_v63  ;;  %2064 = vmatpush.bf16.msra.mxu3 %v1832_v63 }
 0x2bb   : > { %1112 = vmatpush.bf16.msra.mxu0 %v1831_v0  ;;  %2065 = vmatpush.bf16.msra.mxu1 %v1831_v0 }
 0x2bc   : > { %2066 = vmatpush.bf16.msra.mxu2 %v1831_v0  ;;  %2067 = vmatpush.bf16.msra.mxu3 %v1831_v0 }
 0x2bf   : > { %1113 = vmatpush.bf16.msra.mxu0 %v1830_v3  ;;  %2068 = vmatpush.bf16.msra.mxu1 %v1830_v3 }
 0x2c0   : > { %2069 = vmatpush.bf16.msra.mxu2 %v1830_v3  ;;  %2070 = vmatpush.bf16.msra.mxu3 %v1830_v3 }
 0x2c3   : > { %1114 = vmatpush.bf16.msra.mxu0 %v1829_v4  ;;  %2071 = vmatpush.bf16.msra.mxu1 %v1829_v4 }
 0x2c4   : > { %2072 = vmatpush.bf16.msra.mxu2 %v1829_v4  ;;  %2073 = vmatpush.bf16.msra.mxu3 %v1829_v4 }
 0x2c7   : > { %1115 = vmatpush.bf16.msra.mxu0 %v1828_v7  ;;  %2074 = vmatpush.bf16.msra.mxu1 %v1828_v7 }
 0x2c8   : > { %2075 = vmatpush.bf16.msra.mxu2 %v1828_v7  ;;  %2076 = vmatpush.bf16.msra.mxu3 %v1828_v7 }
 0x2cb   : > { %1116 = vmatpush.bf16.msra.mxu0 %v1827_v8  ;;  %2077 = vmatpush.bf16.msra.mxu1 %v1827_v8 }
 0x2cc   : > { %2078 = vmatpush.bf16.msra.mxu2 %v1827_v8  ;;  %2079 = vmatpush.bf16.msra.mxu3 %v1827_v8 }
 0x2ce   : > { %1117 = vmatmul.bf16.vlgmr.msra.gmra.mxu0 %v1819_v11  ;;  %1127 = vmatmul.bf16.vlgmr.msra.gmra.mxu1 %v1821_v12 }
 0x2cf   : > { %1137 = vmatmul.bf16.vlgmr.msra.gmra.mxu2 %v1823_v15  ;;  %1147 = vmatmul.bf16.vlgmr.msra.gmra.mxu3 %v1825_v16 }
 0x2de   : > { %1122 = vmatmul.bf16.gmra.mxu0 %v1820_v19  ;;  %1132 = vmatmul.bf16.gmra.mxu1 %v1822_v20 }
 0x2df   : > { %1142 = vmatmul.bf16.gmra.mxu2 %v1824_v23  ;;  %1152 = vmatmul.bf16.gmra.mxu3 %v1826_v24 }
 0x34b   : > { %v1118_v34 = vpop.f32.mrf.mxu0  ;;  %v1128_v35 = vpop.f32.mrf.mxu1 }
 0x34c   : > { %v2683_v36 = vadd.f32 %v2196_v33, %v1118_v34  ;;  %v2685_v37 = vadd.f32 %v2196_v33, %v1128_v35 }
 0x352   : > { %v1138_v38 = vpop.f32.mrf.mxu2  ;;  %v1148_v39 = vpop.f32.mrf.mxu3 }
 0x353   : > { %v2687_v40 = vadd.f32 %v2196_v33, %v1138_v38  ;;  %v2689_v41 = vadd.f32 %v2196_v33, %v1148_v39  ;;  %v1120_v42 = vpop.f32.mrf.mxu0  ;;  %v1130_v43 = vpop.f32.mrf.mxu1 }
 0x354   : > { %v2691_v44 = vadd.f32 %v2196_v33, %v1120_v42  ;;  %v2693_v45 = vadd.f32 %v2196_v33, %v1130_v43 }
 0x35a   : > { %v1140_v46 = vpop.f32.mrf.mxu2  ;;  %v1150_v47 = vpop.f32.mrf.mxu3 }
 0x35b   : > { %v2695_v48 = vadd.f32 %v2196_v33, %v1140_v46  ;;  %v2697_v49 = vadd.f32 %v2196_v33, %v1150_v47  ;;  %v1123_v50 = vpop.f32.mrf.mxu0  ;;  %v1133_v51 = vpop.f32.mrf.mxu1 }
 0x35c   : > { %v2699_v52 = vadd.f32 %v2196_v33, %v1123_v50  ;;  %v2701_v53 = vadd.f32 %v2196_v33, %v1133_v51 }
 0x362   : > { %v1143_v54 = vpop.f32.mrf.mxu2  ;;  %v1153_v55 = vpop.f32.mrf.mxu3 }
 0x363   : > { %v2703_v56 = vadd.f32 %v2196_v33, %v1143_v54  ;;  %v2705_v57 = vadd.f32 %v2196_v33, %v1153_v55  ;;  %v1125_v58 = vpop.f32.mrf.mxu0  ;;  %v1135_v61 = vpop.f32.mrf.mxu1 }
 0x364   : > { %v2707_v62 = vadd.f32 %v2196_v33, %v1125_v58  ;;  %v2709_v1 = vadd.f32 %v2196_v33, %v1135_v61 }
 0x367   : > { %1161 = sbr.rel (%p1740_p10) target bundleno = 1069 (0x42d), region = 76 }
 0x36a   : > { %v1145_v2 = vpop.f32.mrf.mxu2  ;;  %v1155_v5 = vpop.f32.mrf.mxu3 }
 0x36b   : > { %v2711_v6 = vadd.f32 %v2196_v33, %v1145_v2  ;;  %v2713_v9 = vadd.f32 %v2196_v33, %v1155_v5 }
 0x36c   : > { %v1842_v10 = vld [vmem:[%s2572_s30 + $0x38] sm:$0xff]  ;;  %v1841_v13 = vld [vmem:[%s2572_s30 + $0x30] sm:$0xff]  ;;  %v1840_v14 = vld [vmem:[%s2572_s30 + $0x28] sm:$0xff]  ;;  %v1162_v25 = vmax.f32 %v2683_v36, 0.0  ;;  %v1163_v26 = vmax.f32 %v2691_v44, 0.0  ;;  %v1166_v27 = vmax.f32 %v2685_v37, 0.0 }
 0x36d   : > { %1250 = vmatpush.bf16.msra.mxu0 %v1842_v10  ;;  %2080 = vmatpush.bf16.msra.mxu1 %v1842_v10  ;;  %v1839_v17 = vld [vmem:[%s2572_s30 + $0x20] sm:$0xff]  ;;  %v1838_v18 = vld [vmem:[%s2572_s30 + $0x18] sm:$0xff]  ;;  %v1837_v21 = vld [vmem:[%s2572_s30 + $0x10] sm:$0xff]  ;;  %v1167_v28 = vmax.f32 %v2693_v45, 0.0  ;;  %v1170_v30 = vmax.f32 %v2687_v40, 0.0  ;;  %v1171_v31 = vmax.f32 %v2695_v48, 0.0 }
 0x36e   : > { %2081 = vmatpush.bf16.msra.mxu2 %v1842_v10  ;;  %2082 = vmatpush.bf16.msra.mxu3 %v1842_v10  ;;  %v1836_v22 = vld [vmem:[%s2572_s30 + $0x8] sm:$0xff]  ;;  %v1835_v29 = vld [vmem:[%s2572_s30] sm:$0xff]  ;;  %v1174_v32 = vmax.f32 %v2689_v41, 0.0  ;;  %v1175_v59 = vmax.f32 %v2697_v49, 0.0  ;;  %v1178_v60 = vpack.c.bf16 %v1163_v26, %v1162_v25  ;;  %v1164_v4 = vmax.f32 %v2699_v52, 0.0 }
 0x36f   : > { %v1180_v63 = vpack.c.bf16 %v1167_v28, %v1166_v27  ;;  %v1182_v0 = vpack.c.bf16 %v1171_v31, %v1170_v30  ;;  %v1165_v7 = vmax.f32 %v2707_v62, 0.0  ;;  %v1168_v8 = vmax.f32 %v2701_v53, 0.0 }
 0x370   : > { %v1184_v3 = vpack.c.bf16 %v1175_v59, %v1174_v32  ;;  %v1169_v11 = vmax.f32 %v2709_v1, 0.0  ;;  %v1172_v12 = vmax.f32 %v2703_v56, 0.0  ;;  %v1173_v15 = vmax.f32 %v2711_v6, 0.0 }
 0x371   : > { %1251 = vmatpush.bf16.msra.mxu0 %v1841_v13  ;;  %2083 = vmatpush.bf16.msra.mxu1 %v1841_v13  ;;  %v1176_v16 = vmax.f32 %v2705_v57, 0.0  ;;  %v1177_v19 = vmax.f32 %v2713_v9, 0.0  ;;  %v1179_v20 = vpack.c.bf16 %v1165_v7, %v1164_v4 }
 0x372   : > { %2084 = vmatpush.bf16.msra.mxu2 %v1841_v13  ;;  %2085 = vmatpush.bf16.msra.mxu3 %v1841_v13  ;;  %v1181_v23 = vpack.c.bf16 %v1169_v11, %v1168_v8  ;;  %v1183_v24 = vpack.c.bf16 %v1173_v15, %v1172_v12 }
 0x373   : > { %v1185_v33 = vpack.c.bf16 %v1177_v19, %v1176_v16 }
 0x375   : > { %1252 = vmatpush.bf16.msra.mxu0 %v1840_v14  ;;  %2086 = vmatpush.bf16.msra.mxu1 %v1840_v14 }
 0x376   : > { %2087 = vmatpush.bf16.msra.mxu2 %v1840_v14  ;;  %2088 = vmatpush.bf16.msra.mxu3 %v1840_v14 }
 0x379   : > { %1253 = vmatpush.bf16.msra.mxu0 %v1839_v17  ;;  %2089 = vmatpush.bf16.msra.mxu1 %v1839_v17 }
 0x37a   : > { %2090 = vmatpush.bf16.msra.mxu2 %v1839_v17  ;;  %2091 = vmatpush.bf16.msra.mxu3 %v1839_v17 }
 0x37d   : > { %1254 = vmatpush.bf16.msra.mxu0 %v1838_v18  ;;  %2092 = vmatpush.bf16.msra.mxu1 %v1838_v18 }
 0x37e   : > { %2093 = vmatpush.bf16.msra.mxu2 %v1838_v18  ;;  %2094 = vmatpush.bf16.msra.mxu3 %v1838_v18 }
 0x381   : > { %1255 = vmatpush.bf16.msra.mxu0 %v1837_v21  ;;  %2095 = vmatpush.bf16.msra.mxu1 %v1837_v21 }
 0x382   : > { %2096 = vmatpush.bf16.msra.mxu2 %v1837_v21  ;;  %2097 = vmatpush.bf16.msra.mxu3 %v1837_v21 }
 0x385   : > { %1256 = vmatpush.bf16.msra.mxu0 %v1836_v22  ;;  %2098 = vmatpush.bf16.msra.mxu1 %v1836_v22 }
 0x386   : > { %2099 = vmatpush.bf16.msra.mxu2 %v1836_v22  ;;  %2100 = vmatpush.bf16.msra.mxu3 %v1836_v22 }
 0x389   : > { %1257 = vmatpush.bf16.msra.mxu0 %v1835_v29  ;;  %2101 = vmatpush.bf16.msra.mxu1 %v1835_v29 }
 0x38a   : > { %2102 = vmatpush.bf16.msra.mxu2 %v1835_v29  ;;  %2103 = vmatpush.bf16.msra.mxu3 %v1835_v29 }
 0x38c   : > { %1258 = vmatmul.bf16.vlgmr.msra.gmra.mxu0 %v1178_v60  ;;  %1268 = vmatmul.bf16.vlgmr.msra.gmra.mxu1 %v1180_v63 }
 0x38d   : > { %1278 = vmatmul.bf16.vlgmr.msra.gmra.mxu2 %v1182_v0  ;;  %1288 = vmatmul.bf16.vlgmr.msra.gmra.mxu3 %v1184_v3 }
 0x39c   : > { %1263 = vmatmul.bf16.gmra.mxu0 %v1179_v20  ;;  %1273 = vmatmul.bf16.gmra.mxu1 %v1181_v23 }
 0x39d   : > { %1283 = vmatmul.bf16.gmra.mxu2 %v1183_v24  ;;  %1293 = vmatmul.bf16.gmra.mxu3 %v1185_v33 }
 0x409   : > { %v1259_v34 = vpop.f32.mrf.mxu0  ;;  %v1269_v35 = vpop.f32.mrf.mxu1 }
 0x410   : > { %v1279_v38 = vpop.f32.mrf.mxu2  ;;  %v1289_v39 = vpop.f32.mrf.mxu3 }
 0x411   : > { %v1261_v42 = vpop.f32.mrf.mxu0  ;;  %v1271_v43 = vpop.f32.mrf.mxu1 }
 0x412   : > { %v1926_v46 = vpack.c.bf16 %v1261_v42, %v1259_v34  ;;  %v1936_v47 = vpack.c.bf16 %v1271_v43, %v1269_v35 }
 0x414   : > { %1927 = vst [vmem:[#allocation2 + $0x30] sm:$0xff] %v1926_v46  }
 0x415   : > { %1978 = vst [vmem:[#allocation2 + $0x18] sm:$0xff] %v1936_v47  }
 0x418   : > { %v1281_v50 = vpop.f32.mrf.mxu2  ;;  %v1291_v51 = vpop.f32.mrf.mxu3 }
 0x419   : > { %v1946_v54 = vpack.c.bf16 %v1281_v50, %v1279_v38  ;;  %v1956_v55 = vpack.c.bf16 %v1291_v51, %v1289_v39  ;;  %v1264_v58 = vpop.f32.mrf.mxu0  ;;  %v1274_v61 = vpop.f32.mrf.mxu1 }
 0x41b   : > { %1980 = vst [vmem:[#allocation2 + $0x8] sm:$0xff] %v1946_v54  }
 0x41c   : > { %1982 = vst [vmem:[#allocation2 + $0x28] sm:$0xff] %v1956_v55  }
 0x420   : > { %v1284_v2 = vpop.f32.mrf.mxu2  ;;  %v1294_v5 = vpop.f32.mrf.mxu3 }
 0x421   : > { %v1266_v10 = vpop.f32.mrf.mxu0  ;;  %v1276_v13 = vpop.f32.mrf.mxu1 }
 0x422   : > { %v1931_v14 = vpack.c.bf16 %v1266_v10, %v1264_v58  ;;  %v1941_v17 = vpack.c.bf16 %v1276_v13, %v1274_v61 }
 0x424   : > { %1977 = vst [vmem:[#allocation2] sm:$0xff] %v1931_v14  }
 0x425   : > { %1979 = vst [vmem:[#allocation2 + $0x10] sm:$0xff] %v1941_v17  }
 0x428   : > { %v1286_v18 = vpop.f32.mrf.mxu2  ;;  %v1296_v21 = vpop.f32.mrf.mxu3 }
 0x429   : > { %v1951_v22 = vpack.c.bf16 %v1286_v18, %v1284_v2  ;;  %v1961_v25 = vpack.c.bf16 %v1296_v21, %v1294_v5 }
 0x42b   : > { %1981 = vst [vmem:[#allocation2 + $0x20] sm:$0xff] %v1951_v22  }
 0x42c   : > { %1983 = vst [vmem:[#allocation2 + $0x38] sm:$0xff] %v1961_v25  }
 0x42d PF: > { %p1773_p11 = scmp.ne.s32.totalorder %s2403_s18, 3 }
 0x42f   : > { %1338 = sbr.rel (%p1773_p11) target bundleno = 1092 (0x444), region = 80 }
 0x434   : > { %1339 = vst [vmem:[#allocation12] sm:$0xff] %v2683_v36 }
 0x435   : > { %1340 = vst [vmem:[#allocation12 + $0x8] sm:$0xff] %v2691_v44 }
 0x436   : > { %1341 = vst [vmem:[#allocation12 + $0x10] sm:$0xff] %v2699_v52 }
 0x437   : > { %1342 = vst [vmem:[#allocation12 + $0x18] sm:$0xff] %v2707_v62 }
 0x438   : > { %1343 = vst [vmem:[#allocation12 + $0x20] sm:$0xff] %v2685_v37 }
 0x439   : > { %1344 = vst [vmem:[#allocation12 + $0x28] sm:$0xff] %v2693_v45 }
 0x43a   : > { %1345 = vst [vmem:[#allocation12 + $0x30] sm:$0xff] %v2701_v53 }
 0x43b   : > { %1346 = vst [vmem:[#allocation12 + $0x38] sm:$0xff] %v2709_v1 }
 0x43c   : > { %1347 = vst [vmem:[#allocation12 + $0x40] sm:$0xff] %v2687_v40 }
 0x43d   : > { %1348 = vst [vmem:[#allocation12 + $0x48] sm:$0xff] %v2695_v48 }
 0x43e   : > { %1349 = vst [vmem:[#allocation12 + $0x50] sm:$0xff] %v2703_v56 }
 0x43f   : > { %1350 = vst [vmem:[#allocation12 + $0x58] sm:$0xff] %v2711_v6 }
 0x440   : > { %1351 = vst [vmem:[#allocation12 + $0x60] sm:$0xff] %v2689_v41 }
 0x441   : > { %1352 = vst [vmem:[#allocation12 + $0x68] sm:$0xff] %v2697_v49 }
 0x442   : > { %1353 = vst [vmem:[#allocation12 + $0x70] sm:$0xff] %v2705_v57 }
 0x443   : > { %1354 = vst [vmem:[#allocation12 + $0x78] sm:$0xff] %v2713_v9 }
 0x444 PF: > { %p2138_p12 = scmp.eq.s32.totalorder %s2512_s11, 3  ;;  %s1365_s7 = sshll.u32 %s2783_s4, 4  ;;  %s1366_s7 = int_to_ptr.hbm [resolvable:$true] %s1365_s7 }
 0x445   : > { %s2417_s9 = smov [#allocation12]   ;;  %s2418_s22 = smov 128  }
 0x446   : > { %s1363_s10 = sshll.u32 %s2417_s9, 4  ;;  %s2419_s13 = smov 8   ;;  %s1364_s10 = int_to_ptr.vmem [resolvable:$true] %s1363_s10 }
 0x447   : > { %2117 = dma.vmem_to_hbm [thread:$0]  (%p2138_p12), %s1364_s10, 2048, %s1366_s7, [#allocation6], %s2418_s22, %s2418_s22, %s2419_s13  }
 0x448   : > { %2386 = dma.done.wait (%p2138_p12), [#allocation6], 2048  }
 0x449   : > { %2388 = vsyncadd (%p2138_p12), [#allocation6], 4294965248 }
 0x44a PF: > { %s24_s20 = sadd.s32 1, %s2411_s20   ;;  %s2794_s15 = smov %s2395_s16 }
 0x44b   : > { %p21_p13 = scmp.ge.s32.totalorder %s24_s20, 6   ;;  %s2795_s16 = smov %s2399_s17 }
 0x44c   : > { %s2796_s17 = smov %s2540_s25  ;;  %s2797_s18 = smov %s2407_s19 }
 0x44d   : > { %s2798_s19 = smov %s2800_s12  ;;  %23 = sbr.rel (!%p21_p13) target bundleno = 12 (0xc), region = 142 }
 0x452   :  { %1382 = vsyncpa [#allocation5], 1 }
 0x453   :  { %1384 = vsyncpa [#allocation5 + $0x1], 1 }
 0x454   :  { %1385 = vsyncpa [#allocation8], 1 }
 0x455   :  { %1387 = vsyncpa [#allocation8 + $0x1], 1 }
 0x456   :  { %1388 = vsyncpa [#allocation11], 1 }
 0x457   :  { %1390 = vsyncpa [#allocation11 + $0x1], 1 }
 0x458   :  { %1391 = vsyncpa [#allocation6], 1 }
 0x459   :  { %1393 = vsyncpa [#allocation6 + $0x1], 1 }

</bundles_post_ra>
